<compile_context>
chip_gen: v6e
topology: v6e:2x2x1
jax: 0.10.0
libtpu: 0.0.40
codegen_flags: <defaults>
</compile_context>

<pallas_src>
import functools

import jax
import jax.numpy as jnp
from jax import lax
from jax.experimental import pallas as pl
from jax.experimental.pallas import tpu as pltpu

EPS = 1e-5                     # nn.BatchNorm1d default
LANE = 128
SUBLANE = 8
VMEM_LIMIT_BYTES = 48 * 1024 * 1024   # < 64 MiB physical on v7x, safe on v5e/v6e


def _round_down(x, m):
    return x // m * m


def _largest_divisor_leq(n, cap):
    """Largest divisor of n that is <= cap (>= 1)."""
    cap = max(1, min(n, cap))
    for k in range(cap, 0, -1):
        if n % k == 0:
            return k
    return 1


# --------------- Path A: whole-M resident, grid over channel tiles ----------
def _tbn_resident_kernel(x_ref, gamma_ref, beta_ref, o_ref, *, inv_m):
    x = x_ref[...].astype(jnp.float32)
    # Fused single pass: per-channel sum and sum of squares.
    mean = jnp.sum(x, axis=0, keepdims=True) * inv_m
    var = jnp.maximum(jnp.sum(x * x, axis=0, keepdims=True) * inv_m - mean * mean, 0.0)
    a = lax.rsqrt(var + EPS) * gamma_ref[...]
    b = beta_ref[...] - mean * a
    o_ref[...] = (x * a + b).astype(o_ref.dtype)          # one FMA per element


# --------------- Path B: two pipelined passes over HBM ----------------------
def _tbn_stats_kernel(gamma_ref, beta_ref, x_ref, a_ref, b_ref, *, inv_m, m_total, tm):
    mi = pl.program_id(1)

    @pl.when(mi == 0)
    def _():
        a_ref[...] = jnp.zeros_like(a_ref)    # running per-channel sum
        b_ref[...] = jnp.zeros_like(b_ref)    # running per-channel sum of squares

    x = x_ref[...].astype(jnp.float32)
    if m_total % tm != 0:
        # Last M tile overhangs the array: zero the out-of-range rows so they
        # do not contaminate the statistics (static check -> no cost otherwise).
        row = mi * tm + lax.broadcasted_iota(jnp.int32, x.shape, 0)
        x = jnp.where(row < m_total, x, 0.0)
    a_ref[...] += jnp.sum(x, axis=0, keepdims=True)
    b_ref[...] += jnp.sum(x * x, axis=0, keepdims=True)

    @pl.when(mi == pl.num_programs(1) - 1)
    def _():
        # Convert accumulated sums to the affine scale/shift in-place.
        mean = a_ref[...] * inv_m
        var = jnp.maximum(b_ref[...] * inv_m - mean * mean, 0.0)
        a = lax.rsqrt(var + EPS) * gamma_ref[...]
        a_ref[...] = a
        b_ref[...] = beta_ref[...] - mean * a


def _tbn_apply_kernel(a_ref, b_ref, x_ref, o_ref):
    o_ref[...] = (x_ref[...].astype(jnp.float32) * a_ref[...]
                  + b_ref[...]).astype(o_ref.dtype)


def temporal_batch_norm(x, gamma, beta, *, vmem_tile_budget=24 * 1024 * 1024):
    """Training-mode BatchNorm over the channel (last) dim of x: (N, T, C)."""
    n, t, c = x.shape
    m = n * t
    dtype = x.dtype
    inv_m = 1.0 / m
    itemsize = x.dtype.itemsize
    x2d = x.reshape(m, c)                                   # row-major view, no copy
    g2 = gamma.astype(jnp.float32).reshape(1, c)
    b2 = beta.astype(jnp.float32).reshape(1, c)

    # Bytes in flight per channel column per grid step:
    # double-buffered input + double-buffered output, f32 headroom for temps.
    max_tc = vmem_tile_budget // (16 * m)

    if max_tc >= min(c, LANE):
        # ------------------ Path A: column slab resident over all of M -------
        if c <= LANE:
            tc = c                                          # full extent, one block
        elif c % LANE == 0:
            n128 = c // LANE
            cap = min(max_tc // LANE, max(1, n128 // 2), 32)  # >=2 tiles for megacore
            tc = _largest_divisor_leq(n128, cap) * LANE       # divides C exactly
        elif c <= max_tc:
            tc = c                                          # full extent, one block
        else:
            tc = _round_down(max_tc, LANE)                  # rare: last tile overhangs
        grid_c = pl.cdiv(c, tc)

        out2d = pl.pallas_call(
            functools.partial(_tbn_resident_kernel, inv_m=inv_m),
            out_shape=jax.ShapeDtypeStruct((m, c), dtype),
            grid=(grid_c,),
            in_specs=[
                pl.BlockSpec((m, tc), lambda j: (0, j)),
                pl.BlockSpec((1, tc), lambda j: (0, j)),
                pl.BlockSpec((1, tc), lambda j: (0, j)),
            ],
            out_specs=pl.BlockSpec((m, tc), lambda j: (0, j)),
            compiler_params=pltpu.CompilerParams(
                dimension_semantics=("parallel",),
                vmem_limit_bytes=VMEM_LIMIT_BYTES,
            ),
            cost_estimate=pl.CostEstimate(
                flops=7 * m * c,
                transcendentals=c,
                bytes_accessed=2 * m * c * itemsize,
            ),
        )(x2d, g2, b2)
        return out2d.reshape(n, t, c)

    # ---------------------- Path B: two pipelined passes ---------------------
    if c <= LANE:
        tc = c
    elif c % LANE == 0:
        tc = _largest_divisor_leq(c // LANE, 4) * LANE      # divides C, <= 512 lanes
    elif c <= 4 * LANE:
        tc = c
    else:
        tc = 4 * LANE                                       # rare: last tile overhangs
    grid_c = pl.cdiv(c, tc)

    tm = _round_down(vmem_tile_budget // (16 * tc), SUBLANE)
    tm = max(SUBLANE, min(tm, 2048))
    if tm > m:
        tm = max(SUBLANE, _round_down(m, SUBLANE)) if m >= SUBLANE else m
    grid_m = pl.cdiv(m, tm)

    # Pass 1: per-channel sum / sum-sq accumulated across M tiles, converted to
    # the affine (a, b) on the final M step.
    a_vec, b_vec = pl.pallas_call(
        functools.partial(_tbn_stats_kernel, inv_m=inv_m, m_total=m, tm=tm),
        out_shape=(
            jax.ShapeDtypeStruct((1, c), jnp.float32),
            jax.ShapeDtypeStruct((1, c), jnp.float32),
        ),
        grid=(grid_c, grid_m),
        in_specs=[
            pl.BlockSpec((1, tc), lambda j, i: (0, j)),
            pl.BlockSpec((1, tc), lambda j, i: (0, j)),
            pl.BlockSpec((tm, tc), lambda j, i: (i, j)),
        ],
        out_specs=(
            pl.BlockSpec((1, tc), lambda j, i: (0, j)),
            pl.BlockSpec((1, tc), lambda j, i: (0, j)),
        ),
        compiler_params=pltpu.CompilerParams(
            dimension_semantics=("parallel", "arbitrary"),
            vmem_limit_bytes=VMEM_LIMIT_BYTES,
        ),
        cost_estimate=pl.CostEstimate(
            flops=3 * m * c, transcendentals=c, bytes_accessed=m * c * itemsize),
    )(g2, b2, x2d)

    # Pass 2: re-stream M tiles and apply y = x*a + b.
    out2d = pl.pallas_call(
        _tbn_apply_kernel,
        out_shape=jax.ShapeDtypeStruct((m, c), dtype),
        grid=(grid_c, grid_m),
        in_specs=[
            pl.BlockSpec((1, tc), lambda j, i: (0, j)),
            pl.BlockSpec((1, tc), lambda j, i: (0, j)),
            pl.BlockSpec((tm, tc), lambda j, i: (i, j)),
        ],
        out_specs=pl.BlockSpec((tm, tc), lambda j, i: (i, j)),
        compiler_params=pltpu.CompilerParams(
            dimension_semantics=("parallel", "parallel"),
            vmem_limit_bytes=VMEM_LIMIT_BYTES,
        ),
        cost_estimate=pl.CostEstimate(
            flops=2 * m * c, transcendentals=0, bytes_accessed=2 * m * c * itemsize),
    )(a_vec, b_vec, x2d)
    return out2d.reshape(n, t, c)


def _reference(x, gamma, beta):
    # Plain-JAX reference of BatchNorm1d (training mode) over the channel dim.
    n, t, c = x.shape
    x2d = x.reshape(n * t, c).astype(jnp.float32)
    mean = jnp.mean(x2d, axis=0, keepdims=True)
    var = jnp.mean((x2d - mean) ** 2, axis=0, keepdims=True)
    y = (x2d - mean) / jnp.sqrt(var + EPS) * gamma[None, :] + beta[None, :]
    return y.reshape(n, t, c).astype(x.dtype)


if __name__ == "__main__":
    key = jax.random.PRNGKey(0)
    kx, kg, kb, kx2, kx3 = jax.random.split(key, 5)

    # Small shape implied by the module: batch=2, seq=8, channels=4.
    N, T, C = 2, 8, 4
    x = jax.random.normal(kx, (N, T, C), dtype=jnp.float32)
    gamma = 1.0 + 0.1 * jax.random.normal(kg, (C,), dtype=jnp.float32)
    beta = 0.1 * jax.random.normal(kb, (C,), dtype=jnp.float32)

    out = jax.block_until_ready(temporal_batch_norm(x, gamma, beta))
    ref = _reference(x, gamma, beta)
    assert out.shape == (N, T, C)
    assert jnp.allclose(out, ref, atol=2e-5, rtol=2e-5), "resident path mismatch"

    # Lane-aligned channels: exercises the tiled (multi-step, megacore) Path A.
    N3, T3, C3 = 2, 64, 256
    x3 = jax.random.normal(kx3, (N3, T3, C3), dtype=jnp.float32)
    g3 = 1.0 + 0.05 * jax.random.normal(kg, (C3,), dtype=jnp.float32)
    b3 = 0.05 * jax.random.normal(kb, (C3,), dtype=jnp.float32)
    out3 = jax.block_until_ready(temporal_batch_norm(x3, g3, b3))
    ref3 = _reference(x3, g3, b3)
    assert jnp.allclose(out3, ref3, atol=2e-5, rtol=2e-5), "tiled path mismatch"

    # Exercise the two-pass (large-M) path by forcing a tiny tile budget.
    N2, T2, C2 = 4, 100, 20
    x2 = jax.random.normal(kx2, (N2, T2, C2), dtype=jnp.float32)
    g2 = jnp.full((C2,), 1.3, jnp.float32)
    b2 = jnp.full((C2,), -0.2, jnp.float32)
    out2 = jax.block_until_ready(
        temporal_batch_norm(x2, g2, b2, vmem_tile_budget=64 * 1024))
    ref2 = _reference(x2, g2, b2)
    assert jnp.allclose(out2, ref2, atol=2e-5, rtol=2e-5), "two-pass path mismatch"

    print("KERNEL_OK")
</pallas_src>

<mosaic_0001>
module attributes {stable_mosaic.version = 11 : i64} {
  func.func @_tbn_resident_kernel(%arg0: i32, %arg1: memref<16x4xf32, #tpu.memory_space<vmem>>, %arg2: memref<1x4xf32, #tpu.memory_space<vmem>>, %arg3: memref<1x4xf32, #tpu.memory_space<vmem>>, %arg4: memref<16x4xf32, #tpu.memory_space<vmem>>) attributes {dimension_semantics = [#tpu.dimension_semantics<parallel>], iteration_bounds = array<i64: 1>, scalar_prefetch = 0 : i64, scratch_operands = 0 : i64, tpu.core_type = #tpu.core_type<tc>, window_params = [{transform_indices = @transform_0, window_bounds = array<i64: 16, 4>}, {transform_indices = @transform_1, window_bounds = array<i64: 1, 4>}, {transform_indices = @transform_2, window_bounds = array<i64: 1, 4>}, {transform_indices = @transform_3, window_bounds = array<i64: 16, 4>}]} {
    %c0 = arith.constant 0 : index
    %c0_0 = arith.constant 0 : index
    %0 = vector.load %arg1[%c0, %c0_0] : memref<16x4xf32, #tpu.memory_space<vmem>>, vector<16x4xf32>
    %cst = arith.constant dense<0.000000e+00> : vector<4xf32>
    %1 = vector.multi_reduction <add>, %0, %cst [0] : vector<16x4xf32> to vector<4xf32>
    %2 = vector.shape_cast %1 : vector<4xf32> to vector<1x4xf32>
    %cst_1 = arith.constant 6.250000e-02 : f32
    %3 = vector.broadcast %cst_1 : f32 to vector<1x4xf32>
    %4 = arith.mulf %2, %3 : vector<1x4xf32>
    %5 = arith.mulf %0, %0 : vector<16x4xf32>
    %cst_2 = arith.constant dense<0.000000e+00> : vector<4xf32>
    %6 = vector.multi_reduction <add>, %5, %cst_2 [0] : vector<16x4xf32> to vector<4xf32>
    %7 = vector.shape_cast %6 : vector<4xf32> to vector<1x4xf32>
    %cst_3 = arith.constant 6.250000e-02 : f32
    %8 = vector.broadcast %cst_3 : f32 to vector<1x4xf32>
    %9 = arith.mulf %7, %8 : vector<1x4xf32>
    %10 = arith.mulf %4, %4 : vector<1x4xf32>
    %11 = arith.subf %9, %10 : vector<1x4xf32>
    %cst_4 = arith.constant 0.000000e+00 : f32
    %12 = vector.broadcast %cst_4 : f32 to vector<1x4xf32>
    %13 = arith.maximumf %11, %12 : vector<1x4xf32>
    %cst_5 = arith.constant 9.99999974E-6 : f32
    %14 = vector.broadcast %cst_5 : f32 to vector<1x4xf32>
    %15 = arith.addf %13, %14 : vector<1x4xf32>
    %16 = math.rsqrt %15 : vector<1x4xf32>
    %c0_6 = arith.constant 0 : index
    %c0_7 = arith.constant 0 : index
    %17 = vector.load %arg2[%c0_6, %c0_7] : memref<1x4xf32, #tpu.memory_space<vmem>>, vector<1x4xf32>
    %18 = arith.mulf %16, %17 : vector<1x4xf32>
    %c0_8 = arith.constant 0 : index
    %c0_9 = arith.constant 0 : index
    %19 = vector.load %arg3[%c0_8, %c0_9] : memref<1x4xf32, #tpu.memory_space<vmem>>, vector<1x4xf32>
    %20 = arith.mulf %4, %18 : vector<1x4xf32>
    %21 = arith.subf %19, %20 : vector<1x4xf32>
    %22 = vector.broadcast %18 : vector<1x4xf32> to vector<16x4xf32>
    %23 = arith.mulf %0, %22 : vector<16x4xf32>
    %24 = vector.broadcast %21 : vector<1x4xf32> to vector<16x4xf32>
    %25 = arith.addf %23, %24 : vector<16x4xf32>
    %c0_10 = arith.constant 0 : index
    %c0_11 = arith.constant 0 : index
    %26 = vector.load %arg4[%c0_10, %c0_11] : memref<16x4xf32, #tpu.memory_space<vmem>>, vector<16x4xf32>
    tpu.vector_store %arg4[%c0_10, %c0_11], %25 {strides = array<i32>} : memref<16x4xf32, #tpu.memory_space<vmem>>, vector<16x4xf32>,
    return
  }
  func.func @transform_0(%arg0: i32) -> (i32, i32) {
    %c0_i32 = arith.constant 0 : i32
    %c0_i32_0 = arith.constant 0 : i32
    return %c0_i32, %arg0 : i32, i32
  }
  func.func @transform_1(%arg0: i32) -> (i32, i32) {
    %c0_i32 = arith.constant 0 : i32
    %c0_i32_0 = arith.constant 0 : i32
    return %c0_i32, %arg0 : i32, i32
  }
  func.func @transform_2(%arg0: i32) -> (i32, i32) {
    %c0_i32 = arith.constant 0 : i32
    %c0_i32_0 = arith.constant 0 : i32
    return %c0_i32, %arg0 : i32, i32
  }
  func.func @transform_3(%arg0: i32) -> (i32, i32) {
    %c0_i32 = arith.constant 0 : i32
    %c0_i32_0 = arith.constant 0 : i32
    return %c0_i32, %arg0 : i32, i32
  }
}

</mosaic_0001>

<bundles_post_ra>
// kernel: tpu_custom_call.1
= control target key start
LH: loop header
LB: loop body
LE: loop exit
PB: predicated region body
PF: predicated region fallthrough
CT: control target
= control target key end

     0   :  { %vm16_vm0 = vcmask 31744   ;;  %v49_v28 = vlaneseq  ;;  %s115_s0 = inlined_call_operand.vmem [shape: f32[16,4], index: 0, kind: input, shape index: {}]   ;;  %s116_s1 = inlined_call_operand.vmem [shape: f32[1,4], index: 1, kind: input, shape index: {}]   ;;  %s117_s2 = inlined_call_operand.vmem [shape: f32[1,4], index: 2, kind: input, shape index: {}]   ;;  %s118_s3 = inlined_call_operand.vmem [shape: f32[16,4], index: 3, kind: output, shape index: {}]  }
   0x1   :  { %v14_v0 = vld [vmem:[%s115_s0] sm:$0xff]  ;;  %v15_v1 = vld [vmem:[%s115_s0 + $0x8] sm:$0xff] }
   0x2   :  { %v17_v2 = vsel %vm16_vm0, %v14_v0, 0.0  ;;  %v18_v3 = vsel %vm16_vm0, %v15_v1, 0.0  ;;  %v27_v4 = vmul.f32 %v14_v0, %v14_v0  ;;  %v28_v5 = vmul.f32 %v15_v1, %v15_v1  ;;  %v44_v30 = vld [vmem:[%s116_s1] sm:$0x1] }
   0x3   :  { %v19_v6 = vadd.f32 %v18_v3, %v17_v2  ;;  %v50_v29 = vshrl.u32 %v49_v28, 7  ;;  %v46_v34 = vld [vmem:[%s117_s2] sm:$0x1] }
   0x4   :  { %v29_v7 = vsel %vm16_vm0, %v27_v4, 0.0  ;;  %v30_v8 = vsel %vm16_vm0, %v28_v5, 0.0 }
   0x5   :  { %v20_v9 = vrot.slane %v19_v6, 4  ;;  %v31_v10 = vadd.f32 %v30_v8, %v29_v7  ;;  %v51_v31 = vsub.s32 0, %v50_v29 }
   0x7   :  { %v21_v11 = vadd.f32 %v20_v9, %v19_v6  ;;  %v32_v12 = vrot.slane %v31_v10, 4 }
   0x9   :  { %v22_v13 = vrot.slane %v21_v11, 2  ;;  %v33_v14 = vadd.f32 %v32_v12, %v31_v10 }
   0xb   :  { %v23_v15 = vadd.f32 %v22_v13, %v21_v11  ;;  %v34_v16 = vrot.slane %v33_v14, 2 }
   0xd   :  { %v24_v17 = vrot.slane %v23_v15, 1  ;;  %v35_v18 = vadd.f32 %v34_v16, %v33_v14 }
   0xf   :  { %v25_v19 = vadd.f32 %v24_v17, %v23_v15  ;;  %v36_v20 = vrot.slane %v35_v18, 1 }
  0x11   :  { %v26_v21 = vmul.f32 0.0625, %v25_v19  ;;  %v37_v22 = vadd.f32 %v36_v20, %v35_v18 }
  0x13   :  { %v38_v23 = vmul.f32 0.0625, %v37_v22  ;;  %v39_v24 = vmul.f32 %v26_v21, %v26_v21 }
  0x15   :  { %v40_v25 = vsub.f32 %v38_v23, %v39_v24 }
  0x17   :  { %v41_v26 = vmax.f32 %v40_v25, 0.0 }
  0x19   :  { %v42_v27 = vadd.f32 1e-05, %v41_v26 }
  0x1b   :  { %69 = vrsqrt.f32 %v42_v27 }
  0x28   :  { %v70_v32 = vpop.eup %69 }
  0x29   :  { %v45_v33 = vmul.f32 %v70_v32, %v44_v30 }
  0x2b   :  { %v47_v35 = vmul.f32 %v45_v33, %v26_v21  ;;  %v52_v36 = vrot.slane %v45_v33, %v51_v31 }
  0x2d   :  { %v48_v37 = vsub.f32 %v46_v34, %v47_v35  ;;  %v53_v38 = vmul.f32 %v52_v36, %v14_v0  ;;  %v54_v39 = vmul.f32 %v52_v36, %v15_v1 }
  0x2f   :  { %v59_v40 = vrot.slane %v48_v37, %v51_v31 }
  0x31   :  { %v61_v41 = vadd.f32 %v59_v40, %v53_v38  ;;  %v62_v42 = vadd.f32 %v59_v40, %v54_v39 }
  0x33   :  { %63 = vst.msk [vmem:[%s118_s3] sm:$0xff] %vm16_vm0, %v61_v41  ;;  %64 = vst.msk [vmem:[%s118_s3 + $0x8] sm:$0xff] %vm16_vm0, %v62_v42 }

</bundles_post_ra>
